<compile_context>
chip_gen: v7x
topology: tpu7x:2x2x1
jax: 0.10.0
libtpu: 0.0.40
codegen_flags: <defaults>
</compile_context>

<pallas_src>
import functools

import jax
import jax.numpy as jnp
from jax import lax
from jax.experimental import pallas as pl
from jax.experimental.pallas import tpu as pltpu


_INV_SQRT2 = 0.7071067811865476
_MIB = 1024 * 1024


def _round_up(a: int, b: int) -> int:
    return (a + b - 1) // b * b


def _cdiv(a: int, b: int) -> int:
    return (a + b - 1) // b


def _tpu_vmem_capacity() -> int:
    """Physical VMEM per core; conservative fallback if the query fails."""
    try:
        info = pltpu.get_tpu_info()
        cap = getattr(info, "vmem_capacity_bytes", None)
        if cap:
            return int(cap)
    except Exception:
        pass
    return 64 * _MIB  # v7x per-TensorCore size: safe lower bound everywhere


def _vmem_limit_bytes(vmem_capacity: int) -> int:
    if vmem_capacity >= 96 * _MIB:      # v5e / v6e: 128 MiB physical
        return 100 * _MIB
    # v7x: 64 MiB per TensorCore -> leave headroom for compiler scratch.
    return min(56 * _MIB, int(vmem_capacity * 7 // 8))


def _vmem_estimate(tm: int, th: int, d: int, out_itemsize: int) -> int:
    """Rough double-buffered VMEM footprint of one grid step."""
    bf16 = 2
    x_buf = 2 * tm * d * bf16
    wu_buf = 2 * d * th * bf16
    wd_buf = 2 * th * d * bf16
    bias_buf = 2 * 8 * (max(th, 128) + max(d, 128)) * 4
    out_buf = 2 * tm * d * out_itemsize
    acc = tm * d * 4
    h_tmp = tm * th * (4 + bf16)        # f32 GELU temp + bf16 cast for down-proj
    return x_buf + wu_buf + wd_buf + bias_buf + out_buf + acc + h_tmp


# --------------------------------------------------------------------------- #
# Kernel
# --------------------------------------------------------------------------- #
def _mpt_mlp_kernel(x_ref, wu_ref, bu_ref, wd_ref, bd_ref, o_ref, acc_ref):
    # x_ref:   (tm, D)   bf16 token tile (resident across the hidden axis)
    # wu_ref:  (D, th)   bf16 up_proj weight chunk
    # bu_ref:  (1, th)   f32 up_proj bias chunk
    # wd_ref:  (th, D)   bf16 down_proj weight chunk
    # bd_ref:  (1, D)    f32 down_proj bias
    # o_ref:   (tm, D)   output tile (written once, at the last hidden chunk)
    # acc_ref: (tm, D)   f32 accumulator scratch
    k = pl.program_id(1)

    # Up projection chunk on the MXU (bf16 inputs, f32 accumulation).
    h = jnp.dot(x_ref[...], wu_ref[...], preferred_element_type=jnp.float32)
    h = h + bu_ref[...]

    # Exact GELU (nn.GELU(approximate='none')) in f32.
    h = h * (0.5 * (1.0 + lax.erf(h * _INV_SQRT2)))

    # Partial down projection.
    partial = jnp.dot(h.astype(wd_ref.dtype), wd_ref[...],
                      preferred_element_type=jnp.float32)

    @pl.when(k == 0)
    def _():
        acc_ref[...] = partial          # direct write: no zero-init RMW

    @pl.when(k > 0)
    def _():
        acc_ref[...] += partial

    @pl.when(k == pl.num_programs(1) - 1)
    def _():
        o_ref[...] = (acc_ref[...] + bd_ref[...]).astype(o_ref.dtype)


# --------------------------------------------------------------------------- #
# One-time weight preparation (cast + pad OUTSIDE the per-call path)
# --------------------------------------------------------------------------- #
def prepare_mpt_mlp_weights(w_up, b_up, w_down, b_down, *, th=None,
                            compute_dtype=jnp.bfloat16):
    """Cast weights to the MXU dtype and pad them once.

    w_up:   [d_model, hidden]   (PyTorch weight transposed to in x out)
    b_up:   [hidden]
    w_down: [hidden, d_model]   (PyTorch weight transposed to in x out)
    b_down: [d_model]
    """
    D, H = w_up.shape
    assert w_down.shape == (H, D)

    vmem_cap = _tpu_vmem_capacity()
    vmem_limit = _vmem_limit_bytes(vmem_cap)
    D_pad = _round_up(D, 128)

    if th is None:
        th = 1024 if vmem_cap >= 96 * _MIB else 512
    th = max(128, min(_round_up(th, 128), _round_up(H, 128)))
    # Shrink the hidden chunk until the worst-case (tm=512, f32 out) tile set
    # fits the generation's VMEM budget.
    while th > 128 and _vmem_estimate(512, th, D_pad, 4) > int(0.9 * vmem_limit):
        th = max(128, _round_up(th // 2, 128))

    H_pad = _round_up(H, th)

    wu = w_up.astype(compute_dtype)
    wd = w_down.astype(compute_dtype)
    bu = b_up.astype(jnp.float32).reshape(1, H)
    bd = b_down.astype(jnp.float32).reshape(1, D)
    if H_pad != H or D_pad != D:
        wu = jnp.pad(wu, ((0, D_pad - D), (0, H_pad - H)))
        wd = jnp.pad(wd, ((0, H_pad - H), (0, D_pad - D)))
        bu = jnp.pad(bu, ((0, 0), (0, H_pad - H)))
        bd = jnp.pad(bd, ((0, 0), (0, D_pad - D)))

    return {
        "wu": wu, "bu": bu, "wd": wd, "bd": bd,
        "d_model": D, "hidden": H,
        "th": th, "vmem_limit": vmem_limit,
    }


# --------------------------------------------------------------------------- #
# Per-call wrapper
# --------------------------------------------------------------------------- #
@functools.partial(jax.jit,
                   static_argnames=("tm", "th", "num_m_tiles", "vmem_limit"))
def _mpt_mlp_call(x2, wu, bu, wd, bd, *, tm, th, num_m_tiles, vmem_limit):
    M, D_in = x2.shape
    D_pad, H_pad = wu.shape
    out_dtype = x2.dtype
    M_pad = num_m_tiles * tm

    xc = x2.astype(wu.dtype)
    if M_pad != M or D_pad != D_in:
        xc = jnp.pad(xc, ((0, M_pad - M), (0, D_pad - D_in)))

    grid = (num_m_tiles, H_pad // th)

    cost = pl.CostEstimate(
        flops=4 * M_pad * D_pad * H_pad,                       # two matmuls
        transcendentals=M_pad * H_pad,                         # erf
        bytes_accessed=(
            M_pad * D_pad * jnp.dtype(xc.dtype).itemsize       # x read once
            + grid[0] * 2 * D_pad * H_pad * jnp.dtype(wu.dtype).itemsize  # weights re-streamed per token-tile row
            + grid[0] * (H_pad + D_pad) * 4                    # biases per row
            + M_pad * D_pad * jnp.dtype(out_dtype).itemsize    # output once
        ),
    )

    out = pl.pallas_call(
        _mpt_mlp_kernel,
        out_shape=jax.ShapeDtypeStruct((M_pad, D_pad), out_dtype),
        grid_spec=pltpu.PrefetchScalarGridSpec(
            num_scalar_prefetch=0,
            grid=grid,
            in_specs=[
                pl.BlockSpec((tm, D_pad), lambda i, k: (i, 0)),   # x tile
                pl.BlockSpec((D_pad, th), lambda i, k: (0, k)),   # W_up chunk
                pl.BlockSpec((1, th), lambda i, k: (0, k)),       # b_up chunk
                pl.BlockSpec((th, D_pad), lambda i, k: (k, 0)),   # W_down chunk
                pl.BlockSpec((1, D_pad), lambda i, k: (0, 0)),    # b_down
            ],
            out_specs=pl.BlockSpec((tm, D_pad), lambda i, k: (i, 0)),
            scratch_shapes=[pltpu.VMEM((tm, D_pad), jnp.float32)],
        ),
        compiler_params=pltpu.CompilerParams(
            dimension_semantics=("parallel", "arbitrary"),
            vmem_limit_bytes=vmem_limit,
        ),
        cost_estimate=cost,
    )(xc, wu, bu, wd, bd)

    if M_pad != M or D_pad != D_in:
        out = out[:M, :D_in]
    return out


def mpt_mlp(x, prepared, *, tm=None):
    """MPTMLP forward: down_proj(GELU(up_proj(x))).

    x:        [..., d_model]
    prepared: result of prepare_mpt_mlp_weights (call once per weight set).
    """
    D = prepared["d_model"]
    assert x.shape[-1] == D, "last dim of x must equal d_model"
    orig_shape = x.shape
    x2 = x.reshape(-1, D)
    M = x2.shape[0]

    th = prepared["th"]
    vmem_limit = prepared["vmem_limit"]
    D_pad = prepared["wu"].shape[0]
    out_itemsize = jnp.dtype(x.dtype).itemsize

    # Token-tile cap: large for arithmetic intensity, shrunk until the tile
    # set fits this generation's VMEM budget.
    tm_cap = 512 if tm is None else max(16, _round_up(tm, 16))
    while tm_cap > 16 and (_vmem_estimate(tm_cap, th, D_pad, out_itemsize)
                           > int(0.9 * vmem_limit)):
        tm_cap = max(16, _round_up(tm_cap // 2, 16))

    # Balanced tiles: avoids ~2x wasted work at unlucky M values.
    num_m_tiles = _cdiv(M, tm_cap)
    tm_eff = _round_up(_cdiv(M, num_m_tiles), 16)
    # TODO(synk): for decode-size M on v7x (num_m_tiles == 1) split the hidden
    # axis across the two TensorCores with a cross-core combine instead of
    # leaving one core idle.

    out = _mpt_mlp_call(
        x2, prepared["wu"], prepared["bu"], prepared["wd"], prepared["bd"],
        tm=tm_eff, th=th, num_m_tiles=num_m_tiles, vmem_limit=vmem_limit)
    return out.reshape(orig_shape)


def mpt_mlp_reference(x, w_up, b_up, w_down, b_down):
    h = x @ w_up + b_up
    h = 0.5 * h * (1.0 + lax.erf(h * _INV_SQRT2))
    return h @ w_down + b_down


if __name__ == "__main__":
    # MPTMLP(d_model=128, expansion_ratio=4), batch=2, seq=8.
    d_model = 128
    expansion_ratio = 4
    hidden = expansion_ratio * d_model
    batch, seq = 2, 8

    key = jax.random.PRNGKey(0)
    kx, kwu, kbu, kwd, kbd = jax.random.split(key, 5)

    x = jax.random.normal(kx, (batch, seq, d_model), dtype=jnp.float32)

    # PyTorch nn.Linear stores weight as (out, in); transpose to (in, out).
    w_up_pt = jax.random.normal(kwu, (hidden, d_model), dtype=jnp.float32) * 0.02
    b_up = jax.random.normal(kbu, (hidden,), dtype=jnp.float32) * 0.02
    w_dn_pt = jax.random.normal(kwd, (d_model, hidden), dtype=jnp.float32) * 0.02
    b_dn = jax.random.normal(kbd, (d_model,), dtype=jnp.float32) * 0.02

    w_up = w_up_pt.T      # (d_model, hidden)
    w_dn = w_dn_pt.T      # (hidden, d_model)

    # One-time weight prep (cast to bf16 + pad), outside the per-call path.
    prepared = prepare_mpt_mlp_weights(w_up, b_up, w_dn, b_dn)

    out = mpt_mlp(x, prepared)
    jax.block_until_ready(out)

    ref = mpt_mlp_reference(
        x.reshape(batch * seq, d_model), w_up, b_up, w_dn, b_dn
    ).reshape(batch, seq, d_model)

    # bf16 matmul inputs with f32 accumulation -> small divergence from the
    # pure-f32 reference is expected.
    assert jnp.allclose(out, ref, atol=1e-2, rtol=1e-2), (
        f"mismatch vs reference: max abs diff {jnp.max(jnp.abs(out - ref))}")

    print("KERNEL_OK")
</pallas_src>

<mosaic_0001>
module attributes {stable_mosaic.version = 11 : i64} {
  func.func @_mpt_mlp_kernel(%arg0: i32, %arg1: i32, %arg2: memref<16x128xbf16, #tpu.memory_space<vmem>>, %arg3: memref<128x512xbf16, #tpu.memory_space<vmem>>, %arg4: memref<1x512xf32, #tpu.memory_space<vmem>>, %arg5: memref<512x128xbf16, #tpu.memory_space<vmem>>, %arg6: memref<1x128xf32, #tpu.memory_space<vmem>>, %arg7: memref<16x128xf32, #tpu.memory_space<vmem>>, %arg8: memref<16x128xf32, #tpu.memory_space<vmem>>) attributes {dimension_semantics = [#tpu.dimension_semantics<parallel>, #tpu.dimension_semantics<arbitrary>], iteration_bounds = array<i64: 1, 1>, scalar_prefetch = 0 : i64, scratch_operands = 1 : i64, tpu.core_type = #tpu.core_type<tc>, window_params = [{transform_indices = @transform_0, window_bounds = array<i64: 16, 128>}, {transform_indices = @transform_1, window_bounds = array<i64: 128, 512>}, {transform_indices = @transform_2, window_bounds = array<i64: 1, 512>}, {transform_indices = @transform_3, window_bounds = array<i64: 512, 128>}, {pipeline_mode = #tpu.pipeline_mode<synchronous>, transform_indices = @transform_4, window_bounds = array<i64: 1, 128>}, {transform_indices = @transform_5, window_bounds = array<i64: 16, 128>}]} {
    %c0 = arith.constant 0 : index
    %c0_0 = arith.constant 0 : index
    %0 = vector.load %arg2[%c0, %c0_0] : memref<16x128xbf16, #tpu.memory_space<vmem>>, vector<16x128xbf16>
    %c0_1 = arith.constant 0 : index
    %c0_2 = arith.constant 0 : index
    %1 = vector.load %arg3[%c0_1, %c0_2] : memref<128x512xbf16, #tpu.memory_space<vmem>>, vector<128x512xbf16>
    %cst = arith.constant dense<0.000000e+00> : vector<16x512xf32>
    %2 = tpu.matmul %0, %1, %cst {dimension_numbers = #tpu.dot_dimension_numbers<[1], [0], [0], [1], [0, 0, 1, 1], [], []>} : vector<16x128xbf16>, vector<128x512xbf16>, vector<16x512xf32> -> vector<16x512xf32>
    %c0_3 = arith.constant 0 : index
    %c0_4 = arith.constant 0 : index
    %3 = vector.load %arg4[%c0_3, %c0_4] : memref<1x512xf32, #tpu.memory_space<vmem>>, vector<1x512xf32>
    %4 = vector.broadcast %3 : vector<1x512xf32> to vector<16x512xf32>
    %5 = arith.addf %2, %4 : vector<16x512xf32>
    %cst_5 = arith.constant 0.707106769 : f32
    %6 = vector.broadcast %cst_5 : f32 to vector<16x512xf32>
    %7 = arith.mulf %5, %6 : vector<16x512xf32>
    %8 = math.erf %7 : vector<16x512xf32>
    %cst_6 = arith.constant 1.000000e+00 : f32
    %9 = vector.broadcast %cst_6 : f32 to vector<16x512xf32>
    %10 = arith.addf %9, %8 : vector<16x512xf32>
    %cst_7 = arith.constant 5.000000e-01 : f32
    %11 = vector.broadcast %cst_7 : f32 to vector<16x512xf32>
    %12 = arith.mulf %11, %10 : vector<16x512xf32>
    %13 = arith.mulf %5, %12 : vector<16x512xf32>
    %14 = arith.truncf %13 : vector<16x512xf32> to vector<16x512xbf16>
    %c0_8 = arith.constant 0 : index
    %c0_9 = arith.constant 0 : index
    %15 = vector.load %arg5[%c0_8, %c0_9] : memref<512x128xbf16, #tpu.memory_space<vmem>>, vector<512x128xbf16>
    %cst_10 = arith.constant dense<0.000000e+00> : vector<16x128xf32>
    %16 = tpu.matmul %14, %15, %cst_10 {dimension_numbers = #tpu.dot_dimension_numbers<[1], [0], [0], [1], [0, 0, 1, 1], [], []>} : vector<16x512xbf16>, vector<512x128xbf16>, vector<16x128xf32> -> vector<16x128xf32>
    %c0_i32 = arith.constant 0 : i32
    %17 = arith.cmpi eq, %arg1, %c0_i32 : i32
    %18 = arith.extui %17 : i1 to i32
    %c0_i32_11 = arith.constant 0 : i32
    %19 = arith.cmpi ne, %18, %c0_i32_11 : i32
    scf.if %19 {
      %c0_16 = arith.constant 0 : index
      %c0_17 = arith.constant 0 : index
      %26 = vector.load %arg8[%c0_16, %c0_17] : memref<16x128xf32, #tpu.memory_space<vmem>>, vector<16x128xf32>
      tpu.vector_store %arg8[%c0_16, %c0_17], %16 {strides = array<i32>} : memref<16x128xf32, #tpu.memory_space<vmem>>, vector<16x128xf32>,
    } else {
    }
    %c0_i32_12 = arith.constant 0 : i32
    %20 = arith.cmpi sgt, %arg1, %c0_i32_12 : i32
    %21 = arith.extui %20 : i1 to i32
    %c0_i32_13 = arith.constant 0 : i32
    %22 = arith.cmpi ne, %21, %c0_i32_13 : i32
    scf.if %22 {
      %c0_16 = arith.constant 0 : index
      %c0_17 = arith.constant 0 : index
      %26 = vector.load %arg8[%c0_16, %c0_17] : memref<16x128xf32, #tpu.memory_space<vmem>>, vector<16x128xf32>
      %27 = arith.addf %26, %16 : vector<16x128xf32>
      %c0_18 = arith.constant 0 : index
      %c0_19 = arith.constant 0 : index
      %28 = vector.load %arg8[%c0_18, %c0_19] : memref<16x128xf32, #tpu.memory_space<vmem>>, vector<16x128xf32>
      tpu.vector_store %arg8[%c0_18, %c0_19], %27 {strides = array<i32>} : memref<16x128xf32, #tpu.memory_space<vmem>>, vector<16x128xf32>,
    } else {
    }
    %c0_i32_14 = arith.constant 0 : i32
    %23 = arith.cmpi eq, %arg1, %c0_i32_14 : i32
    %24 = arith.extui %23 : i1 to i32
    %c0_i32_15 = arith.constant 0 : i32
    %25 = arith.cmpi ne, %24, %c0_i32_15 : i32
    scf.if %25 {
      %c0_16 = arith.constant 0 : index
      %c0_17 = arith.constant 0 : index
      %26 = vector.load %arg8[%c0_16, %c0_17] : memref<16x128xf32, #tpu.memory_space<vmem>>, vector<16x128xf32>
      %c0_18 = arith.constant 0 : index
      %c0_19 = arith.constant 0 : index
      %27 = vector.load %arg6[%c0_18, %c0_19] : memref<1x128xf32, #tpu.memory_space<vmem>>, vector<1x128xf32>
      %28 = vector.broadcast %27 : vector<1x128xf32> to vector<16x128xf32>
      %29 = arith.addf %26, %28 : vector<16x128xf32>
      %c0_20 = arith.constant 0 : index
      %c0_21 = arith.constant 0 : index
      %30 = vector.load %arg7[%c0_20, %c0_21] : memref<16x128xf32, #tpu.memory_space<vmem>>, vector<16x128xf32>
      tpu.vector_store %arg7[%c0_20, %c0_21], %29 {strides = array<i32>} : memref<16x128xf32, #tpu.memory_space<vmem>>, vector<16x128xf32>,
    } else {
    }
    return
  }
  func.func @transform_0(%arg0: i32, %arg1: i32) -> (i32, i32) {
    %c0_i32 = arith.constant 0 : i32
    %c0_i32_0 = arith.constant 0 : i32
    return %arg0, %c0_i32 : i32, i32
  }
  func.func @transform_1(%arg0: i32, %arg1: i32) -> (i32, i32) {
    %c0_i32 = arith.constant 0 : i32
    %c0_i32_0 = arith.constant 0 : i32
    return %c0_i32, %arg1 : i32, i32
  }
  func.func @transform_2(%arg0: i32, %arg1: i32) -> (i32, i32) {
    %c0_i32 = arith.constant 0 : i32
    %c0_i32_0 = arith.constant 0 : i32
    return %c0_i32, %arg1 : i32, i32
  }
  func.func @transform_3(%arg0: i32, %arg1: i32) -> (i32, i32) {
    %c0_i32 = arith.constant 0 : i32
    %c0_i32_0 = arith.constant 0 : i32
    return %arg1, %c0_i32 : i32, i32
  }
  func.func @transform_4(%arg0: i32, %arg1: i32) -> (i32, i32) {
    %c0_i32 = arith.constant 0 : i32
    %c0_i32_0 = arith.constant 0 : i32
    %c0_i32_1 = arith.constant 0 : i32
    return %c0_i32, %c0_i32_0 : i32, i32
  }
  func.func @transform_5(%arg0: i32, %arg1: i32) -> (i32, i32) {
    %c0_i32 = arith.constant 0 : i32
    %c0_i32_0 = arith.constant 0 : i32
    return %arg0, %c0_i32 : i32, i32
  }
}

</mosaic_0001>

<bundles_post_ra>
// kernel: _mpt_mlp_call.1
= control target key start
LH: loop header
LB: loop body
LE: loop exit
PB: predicated region body
PF: predicated region fallthrough
CT: control target
= control target key end

     0   :  { %10 = vsyncpa [#allocation4], 0  ;;  %s1164_s0 = inlined_call_operand.vmem [shape: bf16[16,128], index: 0, kind: input, shape index: {}]   ;;  %s1165_s1 = inlined_call_operand.hbm [shape: bf16[128,512], index: 1, kind: input, shape index: {}]   ;;  %s1166_s2 = inlined_call_operand.vmem [shape: f32[1,512], index: 2, kind: input, shape index: {}]   ;;  %s1167_s3 = inlined_call_operand.hbm [shape: bf16[512,128], index: 3, kind: input, shape index: {}]   ;;  %s1168_s4 = inlined_call_operand.vmem [shape: f32[1,128], index: 4, kind: input, shape index: {}]   ;;  %s1169_s5 = inlined_call_operand.hbm [shape: f32[16,128], index: 5, kind: output, shape index: {}]  }
   0x1   :  { %11 = vsyncpa [#allocation7], 0 }
   0x2   :  { %12 = vsyncpa [#allocation5], 0  ;;  %s1079_s18 = smov [#allocation3]   ;;  %s1007_s22 = scalar_lea.hbm %s1165_s1, 4096 }
   0x3   :  { %s20_s19 = sshll.u32 %s1079_s18, 4  ;;  %p1008_p0 = scmp.ne.s32.totalorder %s1165_s1, %s1007_s22  ;;  %s21_s19 = int_to_ptr.vmem [resolvable:$true] %s20_s19 }
   0x4   :  { %p1011_p1 = scmp.lt.u32.totalorder %s1007_s22, %s1165_s1 }
   0x6   :  { %p1013_p2 = pnand %p1011_p1, %p1008_p0 }
   0x8   :  { %1016 = shalt.err (!%p1013_p2)
}
   0x9   :  { %s1017_s27 = scalar_lea.vmem %s21_s19, 4096  ;;  %p1022_p4 = scmp.lt.s32.totalorder %s21_s19, %s21_s19 }
   0xa   :  { %p1018_p3 = scmp.ne.s32.totalorder %s21_s19, %s1017_s27  ;;  %p1023_p5 = scmp.lt.s32.totalorder %s1017_s27, %s1017_s27 }
   0xc   :  { %p1024_p6 = por %p1023_p5, %p1022_p4 }
   0xe   :  { %p1025_p7 = pnand %p1024_p6, %p1018_p3 }
  0x10   :  { %1028 = shalt.err (!%p1025_p7)
}
  0x11   :  { %s1080_s28 = smov 256   ;;  %s1081_s29 = smov 16  }
  0x12   :  { %26 = dma.hbm_to_vmem [thread:$0]  %s1165_s1, 4096, %s21_s19, [#allocation4], %s1080_s28, %s1080_s28, %s1081_s29  }
  0x13   :  { %s1082_s7 = smov [#allocation6]   ;;  %s1029_s11 = scalar_lea.hbm %s1167_s3, 4096 }
  0x14   :  { %s34_s8 = sshll.u32 %s1082_s7, 4  ;;  %p1030_p8 = scmp.ne.s32.totalorder %s1167_s3, %s1029_s11  ;;  %s35_s8 = int_to_ptr.vmem [resolvable:$true] %s34_s8 }
  0x15   :  { %p1033_p9 = scmp.lt.u32.totalorder %s1029_s11, %s1167_s3 }
  0x17   :  { %p1035_p10 = pnand %p1033_p9, %p1030_p8 }
  0x19   :  { %1038 = shalt.err (!%p1035_p10)
}
  0x1a   :  { %s1039_s16 = scalar_lea.vmem %s35_s8, 4096  ;;  %p1044_p12 = scmp.lt.s32.totalorder %s35_s8, %s35_s8 }
  0x1b   :  { %p1040_p11 = scmp.ne.s32.totalorder %s35_s8, %s1039_s16  ;;  %p1045_p13 = scmp.lt.s32.totalorder %s1039_s16, %s1039_s16 }
  0x1d   :  { %p1046_p0 = por %p1045_p13, %p1044_p12 }
  0x1f   :  { %p1047_p1 = pnand %p1046_p0, %p1040_p11 }
  0x21   :  { %1050 = shalt.err (!%p1047_p1)
}
  0x22   :  { %s1083_s1 = smov 64   ;;  %s1084_s17 = smov 4  }
  0x23   :  { %40 = dma.hbm_to_vmem [thread:$0]  %s1167_s3, 4096, %s35_s8, [#allocation7], %s1083_s1, %s1083_s1, %s1084_s17  }
  0x24   :  { %1073 = dma.done.wait [#allocation4], 4096  }
  0x25   :  { %1074 = vsyncadd [#allocation4], 4294963200 }
  0x26   :  { %1075 = dma.done.wait [#allocation7], 4096  }
  0x27   :  { %1076 = vsyncadd [#allocation7], 4294963200  ;;  %v1085_v0 = vmov 0   ;;  %v910_v1 = vld [vmem:[#allocation3 + $0x4] ss:$16 sps:$4 sm:$0xff]   ;;  %v963_v38 = vld [vmem:[#allocation6 + $0x48] sm:$0xff]  }
  0x28   :  { %304 = vmatprep.mubr.bf16.mxu0 %v1085_v0  ;;  %347 = vmatprep.mubr.bf16.mxu1 %v1085_v0  ;;  %v912_v2 = vld [vmem:[#allocation3 + $0xc] ss:$16 sps:$4 sm:$0xff]   ;;  %v914_v3 = vld [vmem:[#allocation3] ss:$16 sps:$4 sm:$0xff]   ;;  %v915_v4 = vld [vmem:[#allocation3 + $0x8] ss:$16 sps:$4 sm:$0xff]  }
  0x29   :  { %272 = vmatprep.subr.bf16.mxu0 %v910_v1  ;;  %315 = vmatprep.subr.bf16.mxu1 %v912_v2  ;;  %v916_v5 = vld [vmem:[#allocation3 + $0x24] ss:$16 sps:$4 sm:$0xff]   ;;  %v918_v6 = vld [vmem:[#allocation3 + $0x2c] ss:$16 sps:$4 sm:$0xff]   ;;  %v920_v7 = vld [vmem:[#allocation3 + $0x20] ss:$16 sps:$4 sm:$0xff]   ;;  %v86_v2 = vlaneseq }
  0x2a   :  { %273 = vmatpush1.bf16.msra.mxu0 %v914_v3  ;;  %316 = vmatpush1.bf16.msra.mxu1 %v915_v4  ;;  %v921_v8 = vld [vmem:[#allocation3 + $0x28] ss:$16 sps:$4 sm:$0xff]   ;;  %v922_v9 = vld [vmem:[#allocation3 + $0x44] ss:$16 sps:$4 sm:$0xff]   ;;  %v924_v10 = vld [vmem:[#allocation3 + $0x4c] ss:$16 sps:$4 sm:$0xff]  }
  0x2b   :  { %274 = vmatprep.subr.bf16.mxu0 %v916_v5  ;;  %317 = vmatprep.subr.bf16.mxu1 %v918_v6  ;;  %v926_v11 = vld [vmem:[#allocation3 + $0x40] ss:$16 sps:$4 sm:$0xff]   ;;  %v927_v12 = vld [vmem:[#allocation3 + $0x48] ss:$16 sps:$4 sm:$0xff]   ;;  %v928_v13 = vld [vmem:[#allocation3 + $0x64] ss:$16 sps:$4 sm:$0xff]  }
  0x2c   :  { %v930_v14 = vld [vmem:[#allocation3 + $0x6c] ss:$16 sps:$4 sm:$0xff]   ;;  %v932_v15 = vld [vmem:[#allocation3 + $0x60] ss:$16 sps:$4 sm:$0xff]   ;;  %v933_v16 = vld [vmem:[#allocation3 + $0x68] ss:$16 sps:$4 sm:$0xff]  }
  0x2d   :  { %v934_v17 = vld [vmem:[#allocation3 + $0x84] ss:$16 sps:$4 sm:$0xff]   ;;  %v936_v18 = vld [vmem:[#allocation3 + $0x8c] ss:$16 sps:$4 sm:$0xff]   ;;  %v938_v19 = vld [vmem:[#allocation3 + $0x80] ss:$16 sps:$4 sm:$0xff]  }
  0x2e   :  { %275 = vmatpush1.bf16.msra.mxu0 %v920_v7  ;;  %318 = vmatpush1.bf16.msra.mxu1 %v921_v8  ;;  %v939_v20 = vld [vmem:[#allocation3 + $0x88] ss:$16 sps:$4 sm:$0xff]   ;;  %v940_v21 = vld [vmem:[#allocation3 + $0xa4] ss:$16 sps:$4 sm:$0xff]   ;;  %v942_v22 = vld [vmem:[#allocation3 + $0xac] ss:$16 sps:$4 sm:$0xff]  }
  0x2f   :  { %276 = vmatprep.subr.bf16.mxu0 %v922_v9  ;;  %319 = vmatprep.subr.bf16.mxu1 %v924_v10  ;;  %v944_v23 = vld [vmem:[#allocation3 + $0xa0] ss:$16 sps:$4 sm:$0xff]   ;;  %v945_v24 = vld [vmem:[#allocation3 + $0xa8] ss:$16 sps:$4 sm:$0xff]   ;;  %v946_v25 = vld [vmem:[#allocation3 + $0xc4] ss:$16 sps:$4 sm:$0xff]  }
  0x30   :  { %v948_v26 = vld [vmem:[#allocation3 + $0xcc] ss:$16 sps:$4 sm:$0xff]   ;;  %v950_v27 = vld [vmem:[#allocation3 + $0xc0] ss:$16 sps:$4 sm:$0xff]   ;;  %v951_v28 = vld [vmem:[#allocation3 + $0xc8] ss:$16 sps:$4 sm:$0xff]  }
  0x31   :  { %v952_v29 = vld [vmem:[#allocation3 + $0xe4] ss:$16 sps:$4 sm:$0xff]   ;;  %v954_v30 = vld [vmem:[#allocation3 + $0xec] ss:$16 sps:$4 sm:$0xff]   ;;  %v956_v31 = vld [vmem:[#allocation3 + $0xe0] ss:$16 sps:$4 sm:$0xff]  }
  0x32   :  { %277 = vmatpush1.bf16.msra.mxu0 %v926_v11  ;;  %320 = vmatpush1.bf16.msra.mxu1 %v927_v12  ;;  %v957_v32 = vld [vmem:[#allocation3 + $0xe8] ss:$16 sps:$4 sm:$0xff]   ;;  %v959_v33 = vld [vmem:[#allocation6 + $0x40] sm:$0xff]   ;;  %v967_v42 = vld [vmem:[#allocation6 + $0x50] sm:$0xff]   ;;  %v87_v3 = vshrl.u32 %v86_v2, 7  ;;  %s1086_s23 = smov [#allocation8]  }
  0x33   :  { %278 = vmatprep.subr.bf16.mxu0 %v928_v13  ;;  %321 = vmatprep.subr.bf16.mxu1 %v930_v14  ;;  %v960_v34 = vld [vmem:[#allocation6 + $0xc0] sm:$0xff]   ;;  %v964_v39 = vld [vmem:[#allocation6 + $0xc8] sm:$0xff]   ;;  %v968_v43 = vld [vmem:[#allocation6 + $0xd0] sm:$0xff]   ;;  %s777_s24 = sshll.u32 %s1086_s23, 4  ;;  %s778_s24 = int_to_ptr.vmem [resolvable:$true] %s777_s24 }
  0x34   :  { %v958_v35 = vld [vmem:[%s1164_s0] sm:$0xff]   ;;  %v965_v40 = vld [vmem:[#allocation6 + $0x8] sm:$0xff]   ;;  %v969_v44 = vld [vmem:[#allocation6 + $0x10] sm:$0xff]   ;;  %v88_v4 = vsub.s32 0, %v87_v3  ;;  %v96_v5 = vsub.s32 2, %v87_v3  ;;  %v92_v7 = vsub.s32 1, %v87_v3  ;;  %p1056_p3 = scmp.lt.s32.totalorder %s778_s24, %s778_s24 }
  0x35   :  { %v961_v36 = vld [vmem:[#allocation6] sm:$0xff]   ;;  %v966_v41 = vld [vmem:[#allocation6 + $0x88] sm:$0xff]   ;;  %v970_v45 = vld [vmem:[#allocation6 + $0x90] sm:$0xff]   ;;  %v100_v8 = vsub.s32 3, %v87_v3  ;;  %s1051_s25 = scalar_lea.vmem %s778_s24, 256 }
  0x36   :  { %279 = vmatpush1.bf16.msra.mxu0 %v932_v15  ;;  %322 = vmatpush1.bf16.msra.mxu1 %v933_v16  ;;  %v962_v37 = vld [vmem:[#allocation6 + $0x80] sm:$0xff]   ;;  %v971_v46 = vld [vmem:[#allocation6 + $0x58] sm:$0xff]   ;;  %v979_v54 = vld [vmem:[#allocation6 + $0x68] sm:$0xff]   ;;  %p1052_p2 = scmp.ne.s32.totalorder %s778_s24, %s1051_s25  ;;  %p1057_p4 = scmp.lt.s32.totalorder %s1051_s25, %s1051_s25 }
  0x37   :  { %280 = vmatprep.subr.bf16.mxu0 %v934_v17  ;;  %323 = vmatprep.subr.bf16.mxu1 %v936_v18  ;;  %v972_v47 = vld [vmem:[#allocation6 + $0xd8] sm:$0xff]   ;;  %v975_v50 = vld [vmem:[#allocation6 + $0x60] sm:$0xff]   ;;  %v980_v55 = vld [vmem:[#allocation6 + $0xe8] sm:$0xff]  }
  0x38   :  { %v973_v48 = vld [vmem:[#allocation6 + $0x18] sm:$0xff]   ;;  %v976_v51 = vld [vmem:[#allocation6 + $0xe0] sm:$0xff]   ;;  %v981_v56 = vld [vmem:[#allocation6 + $0x28] sm:$0xff]   ;;  %p1058_p5 = por %p1057_p4, %p1056_p3 }
  0x39   :  { %v974_v49 = vld [vmem:[#allocation6 + $0x98] sm:$0xff]   ;;  %v977_v52 = vld [vmem:[#allocation6 + $0x20] sm:$0xff]   ;;  %v982_v57 = vld [vmem:[#allocation6 + $0xa8] sm:$0xff]  }
  0x3a   :  { %281 = vmatpush1.bf16.msra.mxu0 %v938_v19  ;;  %324 = vmatpush1.bf16.msra.mxu1 %v939_v20  ;;  %v978_v53 = vld [vmem:[#allocation6 + $0xa0] sm:$0xff]   ;;  %v983_v58 = vld [vmem:[#allocation6 + $0x70] sm:$0xff]   ;;  %v987_v62 = vld [vmem:[#allocation6 + $0x78] sm:$0xff]   ;;  %p1059_p6 = pnand %p1058_p5, %p1052_p2 }
  0x3b   :  { %282 = vmatprep.subr.bf16.mxu0 %v940_v21  ;;  %325 = vmatprep.subr.bf16.mxu1 %v942_v22  ;;  %v984_v59 = vld [vmem:[#allocation6 + $0xf0] sm:$0xff]   ;;  %v988_v63 = vld [vmem:[#allocation6 + $0xf8] sm:$0xff]   ;;  %v84_v6 = vld [vmem:[%s1166_s2] sm:$0xf] }
  0x3c   :  { %v985_v60 = vld [vmem:[#allocation6 + $0x30] sm:$0xff]   ;;  %v989_v0 = vld [vmem:[#allocation6 + $0x38] sm:$0xff]   ;;  %v89_v9 = vrot.slane %v84_v6, %v88_v4  ;;  %v97_v10 = vrot.slane %v84_v6, %v96_v5  ;;  %v93_v11 = vrot.slane %v84_v6, %v92_v7  ;;  %v101_v12 = vrot.slane %v84_v6, %v100_v8 }
  0x3d   :  { %v986_v61 = vld [vmem:[#allocation6 + $0xb0] sm:$0xff]   ;;  %v990_v1 = vld [vmem:[#allocation6 + $0xb8] sm:$0xff]  }
  0x3e   :  { %283 = vmatpush1.bf16.msra.mxu0 %v944_v23  ;;  %326 = vmatpush1.bf16.msra.mxu1 %v945_v24 }
  0x3f   :  { %284 = vmatprep.subr.bf16.mxu0 %v946_v25  ;;  %327 = vmatprep.subr.bf16.mxu1 %v948_v26 }
  0x42   :  { %285 = vmatpush1.bf16.msra.mxu0 %v950_v27  ;;  %328 = vmatpush1.bf16.msra.mxu1 %v951_v28 }
  0x43   :  { %286 = vmatprep.subr.bf16.mxu0 %v952_v29  ;;  %329 = vmatprep.subr.bf16.mxu1 %v954_v30 }
  0x46   :  { %287 = vmatpush1.bf16.msra.mxu0 %v956_v31  ;;  %330 = vmatpush1.bf16.msra.mxu1 %v957_v32 }
  0x47   :  { %856 = vmatprep.subr.bf16.mxu0 %v959_v33  ;;  %878 = vmatprep.subr.bf16.mxu1 %v960_v34 }
  0x49   :  { %305 = vmatmul.mubr.bf16.vlgmr.msra.gmra.mrb[0].mxu0 %v958_v35  ;;  %348 = vmatmul.mubr.bf16.vlgmr.msra.gmra.mrb[0].mxu1 %v958_v35 }
  0x4a   :  { %857 = vmatpush3.bf16.msra.mxu0 %v961_v36  ;;  %879 = vmatpush3.bf16.msra.mxu1 %v962_v37 }
  0x4b   :  { %858 = vmatprep.subr.bf16.mxu0 %v963_v38  ;;  %880 = vmatprep.subr.bf16.mxu1 %v964_v39 }
  0x4e   :  { %859 = vmatpush3.bf16.msra.mxu0 %v965_v40  ;;  %881 = vmatpush3.bf16.msra.mxu1 %v966_v41 }
  0x4f   :  { %860 = vmatprep.subr.bf16.mxu0 %v967_v42  ;;  %882 = vmatprep.subr.bf16.mxu1 %v968_v43 }
  0x52   :  { %861 = vmatpush3.bf16.msra.mxu0 %v969_v44  ;;  %883 = vmatpush3.bf16.msra.mxu1 %v970_v45 }
  0x53   :  { %862 = vmatprep.subr.bf16.mxu0 %v971_v46  ;;  %884 = vmatprep.subr.bf16.mxu1 %v972_v47 }
  0x56   :  { %863 = vmatpush3.bf16.msra.mxu0 %v973_v48  ;;  %885 = vmatpush3.bf16.msra.mxu1 %v974_v49 }
  0x57   :  { %864 = vmatprep.subr.bf16.mxu0 %v975_v50  ;;  %886 = vmatprep.subr.bf16.mxu1 %v976_v51 }
  0x5a   :  { %865 = vmatpush3.bf16.msra.mxu0 %v977_v52  ;;  %887 = vmatpush3.bf16.msra.mxu1 %v978_v53 }
  0x5b   :  { %866 = vmatprep.subr.bf16.mxu0 %v979_v54  ;;  %888 = vmatprep.subr.bf16.mxu1 %v980_v55 }
  0x5e   :  { %867 = vmatpush3.bf16.msra.mxu0 %v981_v56  ;;  %889 = vmatpush3.bf16.msra.mxu1 %v982_v57 }
  0x5f   :  { %868 = vmatprep.subr.bf16.mxu0 %v983_v58  ;;  %890 = vmatprep.subr.bf16.mxu1 %v984_v59 }
  0x62   :  { %869 = vmatpush3.bf16.msra.mxu0 %v985_v60  ;;  %891 = vmatpush3.bf16.msra.mxu1 %v986_v61 }
  0x63   :  { %870 = vmatprep.subr.bf16.mxu0 %v987_v62  ;;  %892 = vmatprep.subr.bf16.mxu1 %v988_v63 }
  0x66   :  { %871 = vmatpush3.bf16.msra.mxu0 %v989_v0  ;;  %893 = vmatpush3.bf16.msra.mxu1 %v990_v1 }
 0x11c   :  { %v306_v13 = vpop.f32.mrb[0].mxu0  ;;  %v349_v14 = vpop.f32.mrb[0].mxu1 }
 0x11d   :  { %v307_v15 = vadd.f32 %v306_v13, %v89_v9  ;;  %v350_v16 = vadd.f32 %v349_v14, %v97_v10  ;;  %v308_v17 = vpop.f32.mrb[1].mxu0  ;;  %v351_v18 = vpop.f32.mrb[1].mxu1 }
 0x11e   :  { %v309_v19 = vadd.f32 %v308_v17, %v93_v11  ;;  %v352_v20 = vadd.f32 %v351_v18, %v101_v12  ;;  %v310_v21 = vpop.f32.mrb[2].mxu0  ;;  %v353_v22 = vpop.f32.mrb[2].mxu1  ;;  %v855_v18 = vld [vmem:[%s1168_s4] ss:$0 sm:$0xff] }
 0x11f   :  { %v358_v23 = vmul.f32 0.70710677, %v307_v15  ;;  %v360_v24 = vmul.f32 0.70710677, %v350_v16  ;;  %v311_v25 = vadd.f32 %v310_v21, %v89_v9  ;;  %v354_v26 = vadd.f32 %v353_v22, %v97_v10  ;;  %v312_v27 = vpop.f32.mrb[3].mxu0  ;;  %v355_v28 = vpop.f32.mrb[3].mxu1 }
 0x120   :  { %v359_v29 = vmul.f32 0.70710677, %v309_v19  ;;  %v361_v30 = vmul.f32 0.70710677, %v352_v20  ;;  %v313_v31 = vadd.f32 %v312_v27, %v93_v11  ;;  %v356_v32 = vadd.f32 %v355_v28, %v101_v12 }
 0x121   :  { %991 = verf.f32 %v358_v23  ;;  %v362_v33 = vmul.f32 0.70710677, %v311_v25  ;;  %v364_v34 = vmul.f32 0.70710677, %v354_v26 }
 0x122   :  { %993 = verf.f32 %v360_v24  ;;  %v363_v35 = vmul.f32 0.70710677, %v313_v31  ;;  %v365_v36 = vmul.f32 0.70710677, %v356_v32 }
 0x123   :  { %995 = verf.f32 %v359_v29 }
 0x124   :  { %997 = verf.f32 %v361_v30 }
 0x125   :  { %999 = verf.f32 %v362_v33 }
 0x126   :  { %1001 = verf.f32 %v364_v34 }
 0x127   :  { %1003 = verf.f32 %v363_v35 }
 0x128   :  { %1005 = verf.f32 %v365_v36 }
 0x12b   :  { %v992_v37 = vpop.eup %991 }
 0x12c   :  { %v994_v38 = vpop.eup %993  ;;  %v374_v39 = vadd.f32 1.0, %v992_v37 }
 0x12d   :  { %v996_v40 = vpop.eup %995  ;;  %v376_v41 = vadd.f32 1.0, %v994_v38 }
 0x12e   :  { %v998_v42 = vpop.eup %997  ;;  %v375_v43 = vadd.f32 1.0, %v996_v40  ;;  %v382_v47 = vmul.f32 0.5, %v374_v39 }
 0x12f   :  { %v1000_v44 = vpop.eup %999  ;;  %v377_v45 = vadd.f32 1.0, %v998_v42  ;;  %v384_v50 = vmul.f32 0.5, %v376_v41 }
 0x130   :  { %v1002_v46 = vpop.eup %1001  ;;  %v378_v48 = vadd.f32 1.0, %v1000_v44  ;;  %v383_v53 = vmul.f32 0.5, %v375_v43  ;;  %v390_v59 = vmul.f32 %v382_v47, %v307_v15 }
 0x131   :  { %v1004_v49 = vpop.eup %1003  ;;  %v380_v51 = vadd.f32 1.0, %v1002_v46  ;;  %v385_v56 = vmul.f32 0.5, %v377_v45  ;;  %v392_v62 = vmul.f32 %v384_v50, %v350_v16 }
 0x132   :  { %v1006_v52 = vpop.eup %1005  ;;  %v386_v54 = vmul.f32 0.5, %v378_v48  ;;  %v379_v55 = vadd.f32 1.0, %v1004_v49  ;;  %v391_v1 = vmul.f32 %v383_v53, %v309_v19 }
 0x133   :  { %v388_v57 = vmul.f32 0.5, %v380_v51  ;;  %v381_v58 = vadd.f32 1.0, %v1006_v52  ;;  %v393_v4 = vmul.f32 %v385_v56, %v352_v20 }
 0x134   :  { %v394_v60 = vmul.f32 %v386_v54, %v311_v25  ;;  %v387_v61 = vmul.f32 0.5, %v379_v55 }
 0x135   :  { %v396_v63 = vmul.f32 %v388_v57, %v354_v26  ;;  %v389_v0 = vmul.f32 0.5, %v381_v58 }
 0x136   :  { %v398_v2 = vpack.c.bf16 %v394_v60, %v390_v59  ;;  %v395_v3 = vmul.f32 %v387_v61, %v313_v31 }
 0x137   :  { %v400_v5 = vpack.c.bf16 %v396_v63, %v392_v62  ;;  %v397_v6 = vmul.f32 %v389_v0, %v356_v32 }
 0x138   :  { %v399_v7 = vpack.c.bf16 %v395_v3, %v391_v1 }
 0x139   :  { %v401_v8 = vpack.c.bf16 %v397_v6, %v393_v4 }
 0x13a   :  { %690 = vmatprep.mubr.bf16.mxu0 %v399_v7 }
 0x13b   :  { %731 = vmatprep.mubr.bf16.mxu1 %v401_v8  ;;  %691 = vmatmul.mubr.bf16.vlgmr.msra.gmra.mrb[4].mxu0 %v398_v2 }
 0x13c   :  { %732 = vmatmul.mubr.bf16.vlgmr.msra.gmra.mrb[4].mxu1 %v400_v5 }
 0x20e   :  { %v872_v9 = vpop.f32.mrb[4].mxu0 }
 0x20f   :  { %v894_v10 = vpop.f32.mrb[4].mxu1  ;;  %v873_v11 = vpop.f32.mrb[5].mxu0 }
 0x210   :  { %v874_v12 = vadd.f32 %v873_v11, %v872_v9  ;;  %v895_v13 = vpop.f32.mrb[5].mxu1  ;;  %v875_v14 = vpop.f32.mrb[6].mxu0 }
 0x211   :  { %v896_v15 = vadd.f32 %v895_v13, %v894_v10  ;;  %v897_v16 = vpop.f32.mrb[6].mxu1  ;;  %v876_v17 = vpop.f32.mrb[7].mxu0 }
 0x212   :  { %v877_v19 = vadd.f32 %v876_v17, %v875_v14  ;;  %v898_v20 = vpop.f32.mrb[7].mxu1 }
 0x213   :  { %v734_v21 = vadd.f32 %v896_v15, %v874_v12  ;;  %v899_v22 = vadd.f32 %v898_v20, %v897_v16 }
 0x215   :  { %v768_v23 = vadd.f32 %v855_v18, %v734_v21  ;;  %v737_v24 = vadd.f32 %v899_v22, %v877_v19 }
 0x217   :  { %770 = vst [vmem:[#allocation8] sm:$0xff] %v768_v23  ;;  %v769_v25 = vadd.f32 %v855_v18, %v737_v24 }
 0x219   :  { %771 = vst [vmem:[#allocation8 + $0x8] sm:$0xff] %v769_v25 }
 0x21a   :  { %1062 = shalt.err (!%p1059_p6)
}
 0x21b   :  { %s1063_s27 = scalar_lea.hbm %s1169_s5, 256 }
 0x21c   :  { %p1064_p7 = scmp.ne.s32.totalorder %s1169_s5, %s1063_s27  ;;  %p1067_p8 = scmp.lt.u32.totalorder %s1063_s27, %s1169_s5 }
 0x21e   :  { %p1069_p9 = pnand %p1067_p8, %p1064_p7 }
 0x220   :  { %1072 = shalt.err (!%p1069_p9)
}
 0x221   :  { %s1087_s7 = smov 128   ;;  %s1088_s8 = smov 8  }
 0x222   :  { %783 = dma.vmem_to_hbm [thread:$0]  %s778_s24, 256, %s1169_s5, [#allocation5], %s1087_s7, %s1087_s7, %s1088_s8  }
 0x223   :  { %1077 = dma.done.wait [#allocation5], 256  }
 0x224   :  { %1078 = vsyncadd [#allocation5], 4294967040 }
 0x225   :  { %787 = vsyncpa [#allocation4], 1 }
 0x226   :  { %788 = vsyncpa [#allocation7], 1 }
 0x227   :  { %789 = vsyncpa [#allocation5], 1 }

</bundles_post_ra>
